<compile_context>
chip_gen: v6e
topology: v6e:2x2x1
jax: 0.10.0
libtpu: 0.0.40
codegen_flags: <defaults>
</compile_context>

<pallas_src>
import functools

import jax
import jax.numpy as jnp
from jax import lax
from jax.experimental import pallas as pl
from jax.experimental.pallas import tpu as pltpu

_LANES = 128


def _accumulate_tile(src_ref, m_ref, l_ref, groups, acc_w):
    """Lane-parallel online-softmax update for one (tn, tc) logits tile.

    groups: static tuple of (start, width) column groups (width <= acc_w);
      columns >= width inside a group are OOB padding and are masked to -inf
      (this only happens for the single partial tail group of the last tile).
    m_ref / l_ref are (tn, acc_w) f32 accumulators: lane j holds the running
    max / running sum-exp over all columns congruent to j (mod acc_w).  The
    hot loop is pure elementwise VPU/EUP work -- no cross-lane reductions.
    """

    def load(start, width):
        x = src_ref[:, start:start + acc_w].astype(jnp.float32)
        if width < acc_w:  # static: only the partial tail group is masked
            lane = lax.broadcasted_iota(jnp.int32, x.shape, 1)
            x = jnp.where(lane < width, x, -jnp.inf)
        return x

    # Pass 1: per-lane max over this tile (VPU max only).
    m_prev = m_ref[...]
    m_new = m_prev
    for start, width in groups:
        m_new = jnp.maximum(m_new, load(start, width))

    # Pass 2: per-lane sum of exp (EUP exp + VPU add); rescale the old sum.
    # On the first class tile m_prev == -inf, so exp(m_prev - m_new) == 0.
    l_new = jnp.exp(m_prev - m_new) * l_ref[...]
    for start, width in groups:
        l_new = l_new + jnp.exp(load(start, width) - m_new)

    m_ref[...] = m_new
    l_ref[...] = l_new


def _lse_kernel(src_ref, out_ref, m_ref, l_ref, *, full_groups, last_groups,
                acc_w):
    """Per-row logsumexp over the class axis via lane-parallel online softmax.

    src_ref: (tn, tc) logits tile (native dtype; promoted to f32 per group)
    out_ref: (tn, 1)  f32 per-row logsumexp
    m_ref/l_ref: (tn, acc_w) f32 per-lane running max / running sum-exp
    """
    k = pl.program_id(1)
    nk = pl.num_programs(1)

    @pl.when(k == 0)
    def _init():
        m_ref[...] = jnp.full(m_ref.shape, -jnp.inf, dtype=jnp.float32)
        l_ref[...] = jnp.zeros(l_ref.shape, dtype=jnp.float32)

    if last_groups == full_groups:
        # C % tc == 0: every class tile is fully valid -> no masking anywhere.
        _accumulate_tile(src_ref, m_ref, l_ref, full_groups, acc_w)
    else:
        @pl.when(k < nk - 1)
        def _full_tile():
            _accumulate_tile(src_ref, m_ref, l_ref, full_groups, acc_w)

        @pl.when(k == nk - 1)
        def _last_tile():
            _accumulate_tile(src_ref, m_ref, l_ref, last_groups, acc_w)

    @pl.when(k == nk - 1)
    def _finalize():
        # Single cross-lane combine per ROW tile (2 XLU reductions total).
        m = m_ref[...]
        m_row = jnp.max(m, axis=-1, keepdims=True)                      # (tn, 1)
        l_row = jnp.sum(l_ref[...] * jnp.exp(m - m_row), axis=-1,
                        keepdims=True)
        out_ref[...] = (m_row + jnp.log(l_row)).astype(out_ref.dtype)


def _column_groups(cols, acc_w):
    """Static (start, width) 128-lane groups covering local columns [0, cols)."""
    groups = []
    start = 0
    while start < cols:
        groups.append((start, min(acc_w, cols - start)))
        start += acc_w
    return tuple(groups)


def cross_entropy_loss(source: jax.Array, target: jax.Array, *,
                       row_tile: int = 256, class_tile: int | None = None,
                       class_stream_bytes: int = 8 * 1024 * 1024) -> jax.Array:
    """Pallas equivalent of the reference CrossEntropyLoss.forward (no reduction)."""
    assert source.ndim == 2
    assert target.ndim == 1
    n, c = source.shape
    assert target.shape[0] == n

    itemsize = jnp.dtype(source.dtype).itemsize

    # Row tile: multiple of 8 sublanes (or the full batch).  For moderate N,
    # aim for >= 2 row blocks so the "parallel" axis spans both TensorCores
    # on v7x (harmless on single-TC v5e/v6e).
    if n > row_tile:
        tn = row_tile
    elif n >= 16:
        tn = ((n + 1) // 2 + 7) // 8 * 8        # ~half the batch, /8 aligned
    else:
        tn = n                                  # tiny batch: one full-extent block

    # Class tile: multiple of 128 lanes, sized so the double-buffered logits
    # stream stays ~class_stream_bytes (default 8 MiB: safe on v5e's 16 MiB
    # scoped default and leaves plenty of headroom on v6e/v7x).  If C fits,
    # collapse the class grid axis entirely (tail columns masked in-kernel).
    if c <= _LANES:
        tc = c
    elif class_tile is not None:
        tc = class_tile                         # caller promise: multiple of 128
    else:
        max_tc = max(
            _LANES,
            (class_stream_bytes // (2 * tn * itemsize)) // _LANES * _LANES)
        tc = min(max_tc, (c + _LANES - 1) // _LANES * _LANES)

    grid_rows = pl.cdiv(n, tn)
    grid_c = pl.cdiv(c, tc)

    acc_w = min(tc, _LANES)
    full_groups = _column_groups(tc, acc_w)
    last_groups = _column_groups(c - (grid_c - 1) * tc, acc_w)

    kernel = functools.partial(_lse_kernel, full_groups=full_groups,
                               last_groups=last_groups, acc_w=acc_w)

    cost = pl.CostEstimate(
        flops=3 * n * c,
        transcendentals=n * c,
        bytes_accessed=n * c * itemsize + grid_rows * tn * 4,
    )

    lse = pl.pallas_call(
        kernel,
        out_shape=jax.ShapeDtypeStruct((grid_rows * tn, 1), jnp.float32),
        grid_spec=pltpu.PrefetchScalarGridSpec(
            num_scalar_prefetch=0,
            grid=(grid_rows, grid_c),
            in_specs=[
                # Logits stream: (tn, tc) tiles, double-buffered by Pallas.
                pl.BlockSpec((tn, tc), lambda i, k: (i, k)),
            ],
            # Output block is constant across the class (reduction) axis.
            out_specs=pl.BlockSpec((tn, 1), lambda i, k: (i, 0)),
            scratch_shapes=[
                pltpu.VMEM((tn, acc_w), jnp.float32),   # per-lane running max
                pltpu.VMEM((tn, acc_w), jnp.float32),   # per-lane running sum-exp
            ],
        ),
        compiler_params=pltpu.CompilerParams(
            dimension_semantics=("parallel", "arbitrary"),
        ),
        cost_estimate=cost,
    )(source)

    # Drop garbage rows from a partial trailing row tile (OOB reads stay
    # row-local, so valid rows are unaffected).
    lse = lse[:n]                                           # (n, 1) f32

    # Target-logit gather outside the kernel; loss_i = lse_i - x[i, target_i].
    # Loss is emitted in f32 regardless of the logits dtype.
    picked = jnp.take_along_axis(source, target.astype(jnp.int32)[:, None],
                                 axis=1)
    return lse - picked.astype(jnp.float32)


if __name__ == "__main__":
    key = jax.random.PRNGKey(0)

    def ref_loss(src, tgt):
        lsm = jax.nn.log_softmax(src.astype(jnp.float32), axis=-1)
        return -lsm[jnp.arange(src.shape[0]), tgt][:, None]

    ok = True

    # 1) Tiny case: single tile in both axes (matches the module's small shapes).
    k0, k1 = jax.random.split(key)
    n, c = 8, 32
    src = jax.random.normal(k0, (n, c), dtype=jnp.float32)
    tgt = jax.random.randint(k1, (n,), 0, c, dtype=jnp.int32)
    out = jax.block_until_ready(cross_entropy_loss(src, tgt))
    ok &= out.shape == (n, 1)
    ok &= bool(jnp.allclose(out, ref_loss(src, tgt), atol=1e-4, rtol=1e-4))

    # 2) Partial row/class tiles: masked tail columns, two row blocks.
    k2, k3 = jax.random.split(k1)
    n, c = 40, 300
    src = jax.random.normal(k2, (n, c), dtype=jnp.float32)
    tgt = jax.random.randint(k3, (n,), 0, c, dtype=jnp.int32)
    out = jax.block_until_ready(cross_entropy_loss(src, tgt))
    ok &= out.shape == (n, 1)
    ok &= bool(jnp.allclose(out, ref_loss(src, tgt), atol=1e-4, rtol=1e-4))

    # 3) Multi class-tile online-softmax path (forced small class tile).
    k4, k5 = jax.random.split(k3)
    n, c = 24, 520
    src = jax.random.normal(k4, (n, c), dtype=jnp.float32)
    tgt = jax.random.randint(k5, (n,), 0, c, dtype=jnp.int32)
    out = jax.block_until_ready(cross_entropy_loss(src, tgt, class_tile=256))
    ok &= out.shape == (n, 1)
    ok &= bool(jnp.allclose(out, ref_loss(src, tgt), atol=1e-4, rtol=1e-4))

    assert ok
    print("KERNEL_OK")
</pallas_src>

<mosaic_0001>
module attributes {stable_mosaic.version = 11 : i64} {
  func.func @_lse_kernel(%arg0: i32, %arg1: i32, %arg2: memref<8x32xf32, #tpu.memory_space<vmem>>, %arg3: memref<8x1xf32, #tpu.memory_space<vmem>>, %arg4: memref<8x32xf32, #tpu.memory_space<vmem>>, %arg5: memref<8x32xf32, #tpu.memory_space<vmem>>) attributes {dimension_semantics = [#tpu.dimension_semantics<parallel>, #tpu.dimension_semantics<arbitrary>], iteration_bounds = array<i64: 1, 1>, scalar_prefetch = 0 : i64, scratch_operands = 2 : i64, tpu.core_type = #tpu.core_type<tc>, window_params = [{transform_indices = @transform_0, window_bounds = array<i64: 8, 32>}, {transform_indices = @transform_1, window_bounds = array<i64: 8, 1>}]} {
    %c0_i32 = arith.constant 0 : i32
    %0 = arith.cmpi eq, %arg1, %c0_i32 : i32
    %1 = arith.extui %0 : i1 to i32
    %c0_i32_0 = arith.constant 0 : i32
    %2 = arith.cmpi ne, %1, %c0_i32_0 : i32
    scf.if %2 {
      %cst = arith.constant 0xFF800000 : f32
      %19 = vector.broadcast %cst : f32 to vector<8x32xf32>
      %c0_14 = arith.constant 0 : index
      %c0_15 = arith.constant 0 : index
      %20 = vector.load %arg4[%c0_14, %c0_15] : memref<8x32xf32, #tpu.memory_space<vmem>>, vector<8x32xf32>
      tpu.vector_store %arg4[%c0_14, %c0_15], %19 {strides = array<i32>} : memref<8x32xf32, #tpu.memory_space<vmem>>, vector<8x32xf32>,
      %cst_16 = arith.constant 0.000000e+00 : f32
      %21 = vector.broadcast %cst_16 : f32 to vector<8x32xf32>
      %c0_17 = arith.constant 0 : index
      %c0_18 = arith.constant 0 : index
      %22 = vector.load %arg5[%c0_17, %c0_18] : memref<8x32xf32, #tpu.memory_space<vmem>>, vector<8x32xf32>
      tpu.vector_store %arg5[%c0_17, %c0_18], %21 {strides = array<i32>} : memref<8x32xf32, #tpu.memory_space<vmem>>, vector<8x32xf32>,
    } else {
    }
    %c0 = arith.constant 0 : index
    %c0_1 = arith.constant 0 : index
    %3 = vector.load %arg4[%c0, %c0_1] : memref<8x32xf32, #tpu.memory_space<vmem>>, vector<8x32xf32>
    %c0_2 = arith.constant 0 : index
    %c0_3 = arith.constant 0 : index
    %4 = vector.load %arg2[%c0_2, %c0_3] : memref<8x32xf32, #tpu.memory_space<vmem>>, vector<8x32xf32>
    %5 = arith.maximumf %3, %4 : vector<8x32xf32>
    %6 = arith.subf %3, %5 : vector<8x32xf32>
    %7 = math.exp %6 : vector<8x32xf32>
    %c0_4 = arith.constant 0 : index
    %c0_5 = arith.constant 0 : index
    %8 = vector.load %arg5[%c0_4, %c0_5] : memref<8x32xf32, #tpu.memory_space<vmem>>, vector<8x32xf32>
    %9 = arith.mulf %7, %8 : vector<8x32xf32>
    %c0_6 = arith.constant 0 : index
    %c0_7 = arith.constant 0 : index
    %10 = vector.load %arg2[%c0_6, %c0_7] : memref<8x32xf32, #tpu.memory_space<vmem>>, vector<8x32xf32>
    %11 = arith.subf %10, %5 : vector<8x32xf32>
    %12 = math.exp %11 : vector<8x32xf32>
    %13 = arith.addf %9, %12 : vector<8x32xf32>
    %c0_8 = arith.constant 0 : index
    %c0_9 = arith.constant 0 : index
    %14 = vector.load %arg4[%c0_8, %c0_9] : memref<8x32xf32, #tpu.memory_space<vmem>>, vector<8x32xf32>
    tpu.vector_store %arg4[%c0_8, %c0_9], %5 {strides = array<i32>} : memref<8x32xf32, #tpu.memory_space<vmem>>, vector<8x32xf32>,
    %c0_10 = arith.constant 0 : index
    %c0_11 = arith.constant 0 : index
    %15 = vector.load %arg5[%c0_10, %c0_11] : memref<8x32xf32, #tpu.memory_space<vmem>>, vector<8x32xf32>
    tpu.vector_store %arg5[%c0_10, %c0_11], %13 {strides = array<i32>} : memref<8x32xf32, #tpu.memory_space<vmem>>, vector<8x32xf32>,
    %c0_i32_12 = arith.constant 0 : i32
    %16 = arith.cmpi eq, %arg1, %c0_i32_12 : i32
    %17 = arith.extui %16 : i1 to i32
    %c0_i32_13 = arith.constant 0 : i32
    %18 = arith.cmpi ne, %17, %c0_i32_13 : i32
    scf.if %18 {
      %c0_14 = arith.constant 0 : index
      %c0_15 = arith.constant 0 : index
      %19 = vector.load %arg4[%c0_14, %c0_15] : memref<8x32xf32, #tpu.memory_space<vmem>>, vector<8x32xf32>
      %cst = arith.constant dense<0xFF800000> : vector<8xf32>
      %20 = vector.multi_reduction <maximumf>, %19, %cst [1] : vector<8x32xf32> to vector<8xf32>
      %21 = vector.shape_cast %20 : vector<8xf32> to vector<8x1xf32>
      %c0_16 = arith.constant 0 : index
      %c0_17 = arith.constant 0 : index
      %22 = vector.load %arg5[%c0_16, %c0_17] : memref<8x32xf32, #tpu.memory_space<vmem>>, vector<8x32xf32>
      %23 = vector.broadcast %21 : vector<8x1xf32> to vector<8x32xf32>
      %24 = arith.subf %19, %23 : vector<8x32xf32>
      %25 = math.exp %24 : vector<8x32xf32>
      %26 = arith.mulf %22, %25 : vector<8x32xf32>
      %cst_18 = arith.constant dense<0.000000e+00> : vector<8xf32>
      %27 = vector.multi_reduction <add>, %26, %cst_18 [1] : vector<8x32xf32> to vector<8xf32>
      %28 = vector.shape_cast %27 : vector<8xf32> to vector<8x1xf32>
      %29 = math.log %28 : vector<8x1xf32>
      %30 = arith.addf %21, %29 : vector<8x1xf32>
      %c0_19 = arith.constant 0 : index
      %c0_20 = arith.constant 0 : index
      %31 = vector.load %arg3[%c0_19, %c0_20] : memref<8x1xf32, #tpu.memory_space<vmem>>, vector<8x1xf32>
      tpu.vector_store %arg3[%c0_19, %c0_20], %30 {strides = array<i32>} : memref<8x1xf32, #tpu.memory_space<vmem>>, vector<8x1xf32>,
    } else {
    }
    return
  }
  func.func @transform_0(%arg0: i32, %arg1: i32) -> (i32, i32) {
    %c0_i32 = arith.constant 0 : i32
    return %arg0, %arg1 : i32, i32
  }
  func.func @transform_1(%arg0: i32, %arg1: i32) -> (i32, i32) {
    %c0_i32 = arith.constant 0 : i32
    %c0_i32_0 = arith.constant 0 : i32
    return %arg0, %c0_i32 : i32, i32
  }
}

</mosaic_0001>

<bundles_post_ra>
// kernel: tpu_custom_call.1
= control target key start
LH: loop header
LB: loop body
LE: loop exit
PB: predicated region body
PF: predicated region fallthrough
CT: control target
= control target key end

     0   :  { %6 = vsyncpa [#allocation5], 0  ;;  %s100_s6 = smov [#allocation4]   ;;  %s125_s0 = inlined_call_operand.hbm [shape: f32[8,32], index: 0, kind: input, shape index: {}]   ;;  %s126_s1 = inlined_call_operand.vmem [shape: f32[8,1], index: 1, kind: output, shape index: {}]  }
   0x1   :  { %s13_s7 = sshll.u32 %s100_s6, 4  ;;  %s14_s7 = int_to_ptr.vmem [resolvable:$true] %s13_s7 }
   0x2   :  { %s86_s8 = scalar_lea.vmem %s14_s7, 128  ;;  %p91_p1 = scmp.lt.s32.totalorder %s14_s7, %s14_s7 }
   0x3   :  { %p87_p0 = scmp.ne.s32.totalorder %s14_s7, %s86_s8  ;;  %p92_p2 = scmp.lt.s32.totalorder %s86_s8, %s86_s8 }
   0x5   :  { %p93_p3 = por %p92_p2, %p91_p1 }
   0x7   :  { %p94_p4 = pnand %p93_p3, %p87_p0 }
   0x9   :  { %97 = shalt.err (!%p94_p4)
}
   0xa   :  { %16 = dma.hbm_to_vmem [thread:$0]  %s125_s0, 128, %s14_s7, [#allocation5]  }
   0xb   :  { %98 = dma.done.wait [#allocation5], 128  }
   0xc   :  { %99 = vsyncadd [#allocation5], 4294967168  ;;  %vm24_vm0 = vcmask 261120   ;;  %v101_v0 = vmov -inf   ;;  %v102_v1 = vmov 0.0   ;;  %v28_v2 = vld [vmem:[#allocation4] sm:$0xff] }
   0xd   :  { %25 = vst.msk [vmem:[#allocation2] sm:$0xff] %vm24_vm0, %v101_v0  ;;  %26 = vst.msk [vmem:[#allocation3] sm:$0xff] %vm24_vm0, %v102_v1  ;;  %vm60_vm1 = vcmask 7168  }
  0x14   :  { %v27_v3 = vld [vmem:[#allocation2] sm:$0xff]  ;;  %v33_v11 = vld [vmem:[#allocation3] sm:$0xff] }
  0x15   :  { %v29_v4 = vmax.f32 %v27_v3, %v28_v2 }
  0x17   :  { %40 = vst.msk [vmem:[#allocation2] sm:$0xff] %vm24_vm0, %v29_v4  ;;  %v30_v5 = vsub.f32 %v27_v3, %v29_v4  ;;  %v35_v6 = vsub.f32 %v28_v2, %v29_v4 }
  0x19   :  { %v31_v7 = vmul.f32 1.442695, %v30_v5  ;;  %v36_v8 = vmul.f32 1.442695, %v35_v6 }
  0x1b   :  { %70 = vpow2.f32 %v31_v7 }
  0x1c   :  { %72 = vpow2.f32 %v36_v8 }
  0x1e   :  { %v45_v9 = vld [vmem:[#allocation2] sm:$0xff] }
  0x1f   :  { %v46_v10 = vsel %vm24_vm0, %v45_v9, -inf }
  0x20   :  { %47 = vmax.xlane.f32.xlu0 %v46_v10 }
  0x28   :  { %v71_v12 = vpop.eup %70 }
  0x29   :  { %v73_v13 = vpop.eup %72  ;;  %v34_v14 = vmul.f32 %v71_v12, %v33_v11 }
  0x2b   :  { %v38_v15 = vadd.f32 %v73_v13, %v34_v14 }
  0x2d   :  { %41 = vst.msk [vmem:[#allocation3] sm:$0xff] %vm24_vm0, %v38_v15 }
  0x34   :  { %v49_v19 = vld [vmem:[#allocation3] sm:$0xff] }
  0xa9   :  { %v48_v16 = vpop.xlane.xlu0 %47 }
  0xaa   :  { %v50_v17 = vsub.f32 %v45_v9, %v48_v16 }
  0xac   :  { %v51_v18 = vmul.f32 1.442695, %v50_v17 }
  0xae   :  { %74 = vpow2.f32 %v51_v18 }
  0xbb   :  { %v75_v20 = vpop.eup %74 }
  0xbc   :  { %v53_v21 = vmul.f32 %v75_v20, %v49_v19 }
  0xbe   :  { %v54_v22 = vsel %vm24_vm0, %v53_v21, 0.0 }
  0xbf   :  { %55 = vadd.xlane.f32.xlu0 %v54_v22 }
 0x148   :  { %v56_v23 = vpop.xlane.xlu0 %55 }
 0x149   :  { %76 = vlog2.f32 %v56_v23 }
 0x156   :  { %v77_v24 = vpop.eup %76 }
 0x157   :  { %v58_v25 = vmul.f32 0.6931472, %v77_v24 }
 0x159   :  { %v59_v26 = vadd.f32 %v58_v25, %v48_v16 }
 0x15b   :  { %61 = vst.msk [vmem:[%s126_s1] sm:$0xff] %vm60_vm1, %v59_v26 }
 0x15c   :  { %66 = vsyncpa [#allocation5], 1 }

</bundles_post_ra>
